<compile_context>
chip_gen: v5e
topology: v5e:2x2
jax: 0.10.0
libtpu: 0.0.40
codegen_flags: <defaults>
</compile_context>

<pallas_src>
import functools

import jax
import jax.numpy as jnp
from jax.experimental import pallas as pl
from jax.experimental.pallas import tpu as pltpu


def _round_up(v: int, m: int) -> int:
    return (v + m - 1) // m * m


def _sagraph_kernel(src_col_ref, dst_col_ref, dst_row_ref, x_ref, ws_ref, wn_ref, b_ref,
                    out_ref, acc_ref, deg_ref, *, tn: int, te: int, mean: bool):
    ni = pl.program_id(0)          # node-block index ("parallel")
    ei = pl.program_id(1)          # edge-block index (reduction axis, "arbitrary", last in grid)

    n_pad = x_ref.shape[0]

    @pl.when(ei == 0)
    def _init():
        acc_ref[...] = jnp.zeros_like(acc_ref)
        if mean:
            deg_ref[...] = jnp.zeros_like(deg_ref)

    src_c = src_col_ref[...]       # (TE, 1) int32 — edge index on sublanes (gather orientation)
    dst_c = dst_col_ref[...]       # (TE, 1) int32
    dst_r = dst_row_ref[...]       # (1, TE) int32 — edge index on lanes (scatter orientation)

    # ---- gather: diff = x[src] - x[dst] as a single fused +/-1 one-hot matmul on the MXU ----
    node_lane = jax.lax.broadcasted_iota(jnp.int32, (te, n_pad), 1)
    oh_gather = ((node_lane == src_c).astype(jnp.float32)
                 - (node_lane == dst_c).astype(jnp.float32))              # (TE, N_pad), one live array
    diff = jnp.dot(oh_gather, x_ref[...], preferred_element_type=jnp.float32)     # (TE, C_in_p)

    # ---- neighbor transform on the MXU ----
    diff_t = jnp.dot(diff, wn_ref[...], preferred_element_type=jnp.float32)       # (TE, C_out_p)

    # ---- scatter_add restricted to this node tile; one-hot built already transposed (TN, TE)
    #      so the MXU sees a plain row-major lhs (no XLU transpose). ----
    row_ids = jax.lax.broadcasted_iota(jnp.int32, (tn, te), 0) + ni * tn
    oh_scatter_t = (row_ids == dst_r).astype(jnp.float32)                         # (TN, TE)
    acc_ref[...] += jnp.dot(oh_scatter_t, diff_t, preferred_element_type=jnp.float32)
    if mean:
        deg_ref[...] += jnp.sum(oh_scatter_t, axis=1, keepdims=True)              # (TN, 1)

    # ---- finalize: out = out_self + out_nb (+ /deg) + bias, one lane-dense store ----
    @pl.when(ei == pl.num_programs(1) - 1)
    def _finalize():
        r0 = pl.multiple_of(ni * tn, tn)
        x_tile = x_ref[pl.ds(r0, tn), :]                                          # (TN, C_in_p)
        out_self = jnp.dot(x_tile, ws_ref[...], preferred_element_type=jnp.float32)
        out_nb = acc_ref[...]
        if mean:
            deg = deg_ref[...]
            deg = jnp.where(deg == 0.0, 1.0, deg)
            out_nb = out_nb / deg
        out_ref[...] = out_self + out_nb + b_ref[...]


def sagraph_layer_v3(x, edge_index, w_self, w_neighbor, bias=None, aggregation="sum",
                     *, tn=128, te=128):
    """Forward pass of SAGraphLayerV3.

    x: (N, C_in) float; edge_index: (2, E) int; w_self / w_neighbor: (C_out, C_in) (torch
    nn.Linear layout); bias: (C_out,) or None; aggregation in {"sum", "mean"}.
    Returns (N, C_out) float32.
    """
    N, c_in = x.shape
    c_out = w_self.shape[0]
    E = edge_index.shape[1]

    lane = 128
    c_in_p = _round_up(c_in, lane)
    c_out_p = _round_up(c_out, lane)
    n_pad = _round_up(max(N, tn), tn)
    e_pad = _round_up(max(E, te), te)
    nn, ne = n_pad // tn, e_pad // te

    x_p = jnp.zeros((n_pad, c_in_p), jnp.float32).at[:N, :c_in].set(x.astype(jnp.float32))
    # torch Linear weight is (out, in); pre-transpose so all in-kernel dots are row-major (in, out).
    ws_p = jnp.zeros((c_in_p, c_out_p), jnp.float32).at[:c_in, :c_out].set(
        jnp.asarray(w_self, jnp.float32).T)
    wn_p = jnp.zeros((c_in_p, c_out_p), jnp.float32).at[:c_in, :c_out].set(
        jnp.asarray(w_neighbor, jnp.float32).T)
    b_p = jnp.zeros((1, c_out_p), jnp.float32)
    if bias is not None:
        b_p = b_p.at[0, :c_out].set(jnp.asarray(bias, jnp.float32))

    # Pad edges with an out-of-range sentinel: padded edges match no node, so they add nothing to
    # the scatter (and nothing to the degree when aggregation == "mean").
    sentinel = n_pad
    src = jnp.asarray(edge_index[0], jnp.int32)
    dst = jnp.asarray(edge_index[1], jnp.int32)
    src_pad = jnp.full((e_pad,), sentinel, jnp.int32).at[:E].set(src)
    dst_pad = jnp.full((e_pad,), sentinel, jnp.int32).at[:E].set(dst)
    src_col = src_pad.reshape(e_pad, 1)    # gather one-hot wants the edge index varying on sublanes
    dst_col = dst_pad.reshape(e_pad, 1)
    dst_row = dst_pad.reshape(1, e_pad)    # transposed scatter one-hot wants it on lanes

    flops = int(2 * nn * e_pad * n_pad * c_in_p            # one-hot gather (recomputed per node block)
                + 2 * nn * e_pad * c_in_p * c_out_p        # neighbor transform (per node block)
                + 2 * e_pad * n_pad * c_out_p              # tile-restricted scatter (total)
                + 2 * n_pad * c_in_p * c_out_p)            # self transform
    bytes_accessed = int(4 * (x_p.size + ws_p.size + wn_p.size + b_p.size + n_pad * c_out_p)
                         + 4 * 3 * e_pad)

    kernel = functools.partial(_sagraph_kernel, tn=tn, te=te, mean=(aggregation == "mean"))

    grid_spec = pltpu.PrefetchScalarGridSpec(
        num_scalar_prefetch=0,
        grid=(nn, ne),
        in_specs=[
            pl.BlockSpec((te, 1), lambda ni, ei: (ei, 0)),            # src (column layout)
            pl.BlockSpec((te, 1), lambda ni, ei: (ei, 0)),            # dst (column layout)
            pl.BlockSpec((1, te), lambda ni, ei: (0, ei)),            # dst (lane-dense row layout)
            pl.BlockSpec((n_pad, c_in_p), lambda ni, ei: (0, 0)),     # x: resident (gather source)
            pl.BlockSpec((c_in_p, c_out_p), lambda ni, ei: (0, 0)),   # W_self^T: resident
            pl.BlockSpec((c_in_p, c_out_p), lambda ni, ei: (0, 0)),   # W_neighbor^T: resident
            pl.BlockSpec((1, c_out_p), lambda ni, ei: (0, 0)),        # bias: resident
        ],
        out_specs=pl.BlockSpec((tn, c_out_p), lambda ni, ei: (ni, 0)),
        scratch_shapes=[pltpu.VMEM((tn, c_out_p), jnp.float32),       # out_neighbors accumulator
                        pltpu.VMEM((tn, 1), jnp.float32)],            # degree accumulator ('mean')
    )

    out_p = pl.pallas_call(
        kernel,
        out_shape=jax.ShapeDtypeStruct((n_pad, c_out_p), jnp.float32),
        grid_spec=grid_spec,
        compiler_params=pltpu.CompilerParams(
            dimension_semantics=("parallel", "arbitrary"),
            vmem_limit_bytes=32 * 1024 * 1024),
        cost_estimate=pl.CostEstimate(flops=flops, transcendentals=0,
                                      bytes_accessed=bytes_accessed),
    )(src_col, dst_col, dst_row, x_p, ws_p, wn_p, b_p)

    return out_p[:N, :c_out]


def _ref_forward(x, edge_index, w_self, w_neighbor, bias, aggregation="sum"):
    """Pure-JAX reference matching the PyTorch forward."""
    src, dst = edge_index[0], edge_index[1]
    out_self = x @ w_self.T
    diff = x[src] - x[dst]
    diff_t = diff @ w_neighbor.T
    out_nb = jax.ops.segment_sum(diff_t, dst, num_segments=x.shape[0])
    if aggregation == "mean":
        deg = jax.ops.segment_sum(jnp.ones(dst.shape, jnp.float32), dst, num_segments=x.shape[0])
        deg = jnp.where(deg == 0, 1.0, deg)
        out_nb = out_nb / deg[:, None]
    out = out_self + out_nb
    if bias is not None:
        out = out + bias
    return out


if __name__ == "__main__":
    keys = jax.random.split(jax.random.PRNGKey(0), 12)

    # --- Case 1: tiny graph, single grid step, aggregation='sum', zero bias ---
    N1, CIN1, COUT1, E1 = 16, 8, 32, 24
    x1 = jax.random.normal(keys[0], (N1, CIN1), jnp.float32)
    edge1 = jnp.stack([jax.random.randint(keys[1], (E1,), 0, N1, dtype=jnp.int32),
                       jax.random.randint(keys[2], (E1,), 0, N1, dtype=jnp.int32)], axis=0)
    b1 = (6.0 / (CIN1 + COUT1)) ** 0.5
    ws1 = jax.random.uniform(keys[3], (COUT1, CIN1), jnp.float32, -b1, b1)
    wn1 = jax.random.uniform(keys[4], (COUT1, CIN1), jnp.float32, -b1, b1)
    bias1 = jnp.zeros((COUT1,), jnp.float32)

    out1 = jax.block_until_ready(sagraph_layer_v3(x1, edge1, ws1, wn1, bias1, "sum"))
    ref1 = _ref_forward(x1, edge1, ws1, wn1, bias1, "sum")
    assert out1.shape == (N1, COUT1)
    assert jnp.allclose(out1, ref1, atol=1e-4, rtol=1e-4), "case 1 (sum) mismatch vs reference"

    # --- Case 2: multi-block grid (2 node blocks x 4 edge blocks), aggregation='mean' ---
    N2, CIN2, COUT2, E2 = 200, 24, 48, 400
    x2 = jax.random.normal(keys[5], (N2, CIN2), jnp.float32)
    edge2 = jnp.stack([jax.random.randint(keys[6], (E2,), 0, N2, dtype=jnp.int32),
                       jax.random.randint(keys[7], (E2,), 0, N2, dtype=jnp.int32)], axis=0)
    b2 = (6.0 / (CIN2 + COUT2)) ** 0.5
    ws2 = jax.random.uniform(keys[8], (COUT2, CIN2), jnp.float32, -b2, b2)
    wn2 = jax.random.uniform(keys[9], (COUT2, CIN2), jnp.float32, -b2, b2)
    bias2 = jax.random.normal(keys[10], (COUT2,), jnp.float32) * 0.1

    out2 = jax.block_until_ready(sagraph_layer_v3(x2, edge2, ws2, wn2, bias2, "mean"))
    ref2 = _ref_forward(x2, edge2, ws2, wn2, bias2, "mean")
    assert out2.shape == (N2, COUT2)
    assert jnp.allclose(out2, ref2, atol=1e-4, rtol=1e-4), "case 2 (mean) mismatch vs reference"

    print("KERNEL_OK")
</pallas_src>

<mosaic_0001>
module attributes {stable_mosaic.version = 11 : i64} {
  func.func @_sagraph_kernel(%arg0: i32, %arg1: i32, %arg2: memref<128x1xi32, #tpu.memory_space<vmem>>, %arg3: memref<128x1xi32, #tpu.memory_space<vmem>>, %arg4: memref<1x128xi32, #tpu.memory_space<vmem>>, %arg5: memref<128x128xf32, #tpu.memory_space<vmem>>, %arg6: memref<128x128xf32, #tpu.memory_space<vmem>>, %arg7: memref<128x128xf32, #tpu.memory_space<vmem>>, %arg8: memref<1x128xf32, #tpu.memory_space<vmem>>, %arg9: memref<128x128xf32, #tpu.memory_space<vmem>>, %arg10: memref<128x128xf32, #tpu.memory_space<vmem>>, %arg11: memref<128x1xf32, #tpu.memory_space<vmem>>) attributes {dimension_semantics = [#tpu.dimension_semantics<parallel>, #tpu.dimension_semantics<arbitrary>], iteration_bounds = array<i64: 1, 1>, scalar_prefetch = 0 : i64, scratch_operands = 2 : i64, tpu.core_type = #tpu.core_type<tc>, window_params = [{transform_indices = @transform_0, window_bounds = array<i64: 128, 1>}, {transform_indices = @transform_1, window_bounds = array<i64: 128, 1>}, {transform_indices = @transform_2, window_bounds = array<i64: 1, 128>}, {pipeline_mode = #tpu.pipeline_mode<synchronous>, transform_indices = @transform_3, window_bounds = array<i64: 128, 128>}, {pipeline_mode = #tpu.pipeline_mode<synchronous>, transform_indices = @transform_4, window_bounds = array<i64: 128, 128>}, {pipeline_mode = #tpu.pipeline_mode<synchronous>, transform_indices = @transform_5, window_bounds = array<i64: 128, 128>}, {pipeline_mode = #tpu.pipeline_mode<synchronous>, transform_indices = @transform_6, window_bounds = array<i64: 1, 128>}, {transform_indices = @transform_7, window_bounds = array<i64: 128, 128>}]} {
    %c0_i32 = arith.constant 0 : i32
    %0 = arith.cmpi eq, %arg1, %c0_i32 : i32
    %1 = arith.extui %0 : i1 to i32
    %c0_i32_0 = arith.constant 0 : i32
    %2 = arith.cmpi ne, %1, %c0_i32_0 : i32
    scf.if %2 {
      %cst_18 = arith.constant 0.000000e+00 : f32
      %35 = vector.broadcast %cst_18 : f32 to vector<128x128xf32>
      %c0_19 = arith.constant 0 : index
      %c0_20 = arith.constant 0 : index
      %36 = vector.load %arg10[%c0_19, %c0_20] : memref<128x128xf32, #tpu.memory_space<vmem>>, vector<128x128xf32>
      tpu.vector_store %arg10[%c0_19, %c0_20], %35 {strides = array<i32>} : memref<128x128xf32, #tpu.memory_space<vmem>>, vector<128x128xf32>,
    } else {
    }
    %c0 = arith.constant 0 : index
    %c0_1 = arith.constant 0 : index
    %3 = vector.load %arg2[%c0, %c0_1] : memref<128x1xi32, #tpu.memory_space<vmem>>, vector<128x1xi32>
    %c0_2 = arith.constant 0 : index
    %c0_3 = arith.constant 0 : index
    %4 = vector.load %arg3[%c0_2, %c0_3] : memref<128x1xi32, #tpu.memory_space<vmem>>, vector<128x1xi32>
    %c0_4 = arith.constant 0 : index
    %c0_5 = arith.constant 0 : index
    %5 = vector.load %arg4[%c0_4, %c0_5] : memref<1x128xi32, #tpu.memory_space<vmem>>, vector<1x128xi32>
    %6 = tpu.iota {dimensions = array<i32: 1>} : vector<128x128xi32>
    %7 = vector.broadcast %3 : vector<128x1xi32> to vector<128x128xi32>
    %8 = arith.cmpi eq, %6, %7 : vector<128x128xi32>
    %9 = arith.extui %8 : vector<128x128xi1> to vector<128x128xi32>
    %10 = arith.sitofp %9 : vector<128x128xi32> to vector<128x128xf32>
    %11 = vector.broadcast %4 : vector<128x1xi32> to vector<128x128xi32>
    %12 = arith.cmpi eq, %6, %11 : vector<128x128xi32>
    %13 = arith.extui %12 : vector<128x128xi1> to vector<128x128xi32>
    %14 = arith.sitofp %13 : vector<128x128xi32> to vector<128x128xf32>
    %15 = arith.subf %10, %14 : vector<128x128xf32>
    %c0_6 = arith.constant 0 : index
    %c0_7 = arith.constant 0 : index
    %16 = vector.load %arg5[%c0_6, %c0_7] : memref<128x128xf32, #tpu.memory_space<vmem>>, vector<128x128xf32>
    %cst = arith.constant dense<0.000000e+00> : vector<128x128xf32>
    %17 = tpu.matmul %15, %16, %cst {dimension_numbers = #tpu.dot_dimension_numbers<[1], [0], [0], [1], [0, 0, 1, 1], [], []>} : vector<128x128xf32>, vector<128x128xf32>, vector<128x128xf32> -> vector<128x128xf32>
    %c0_8 = arith.constant 0 : index
    %c0_9 = arith.constant 0 : index
    %18 = vector.load %arg7[%c0_8, %c0_9] : memref<128x128xf32, #tpu.memory_space<vmem>>, vector<128x128xf32>
    %cst_10 = arith.constant dense<0.000000e+00> : vector<128x128xf32>
    %19 = tpu.matmul %17, %18, %cst_10 {dimension_numbers = #tpu.dot_dimension_numbers<[1], [0], [0], [1], [0, 0, 1, 1], [], []>} : vector<128x128xf32>, vector<128x128xf32>, vector<128x128xf32> -> vector<128x128xf32>
    %20 = tpu.iota {dimensions = array<i32: 0>} : vector<128x128xi32>
    %c128_i32 = arith.constant 128 : i32
    %21 = arith.muli %arg0, %c128_i32 : i32
    %22 = vector.broadcast %21 : i32 to vector<128x128xi32>
    %23 = arith.addi %20, %22 : vector<128x128xi32>
    %24 = vector.broadcast %5 : vector<1x128xi32> to vector<128x128xi32>
    %25 = arith.cmpi eq, %23, %24 : vector<128x128xi32>
    %26 = arith.extui %25 : vector<128x128xi1> to vector<128x128xi32>
    %27 = arith.sitofp %26 : vector<128x128xi32> to vector<128x128xf32>
    %c0_11 = arith.constant 0 : index
    %c0_12 = arith.constant 0 : index
    %28 = vector.load %arg10[%c0_11, %c0_12] : memref<128x128xf32, #tpu.memory_space<vmem>>, vector<128x128xf32>
    %cst_13 = arith.constant dense<0.000000e+00> : vector<128x128xf32>
    %29 = tpu.matmul %27, %19, %cst_13 {dimension_numbers = #tpu.dot_dimension_numbers<[1], [0], [0], [1], [0, 0, 1, 1], [], []>} : vector<128x128xf32>, vector<128x128xf32>, vector<128x128xf32> -> vector<128x128xf32>
    %30 = arith.addf %28, %29 : vector<128x128xf32>
    %c0_14 = arith.constant 0 : index
    %c0_15 = arith.constant 0 : index
    %31 = vector.load %arg10[%c0_14, %c0_15] : memref<128x128xf32, #tpu.memory_space<vmem>>, vector<128x128xf32>
    tpu.vector_store %arg10[%c0_14, %c0_15], %30 {strides = array<i32>} : memref<128x128xf32, #tpu.memory_space<vmem>>, vector<128x128xf32>,
    %c0_i32_16 = arith.constant 0 : i32
    %32 = arith.cmpi eq, %arg1, %c0_i32_16 : i32
    %33 = arith.extui %32 : i1 to i32
    %c0_i32_17 = arith.constant 0 : i32
    %34 = arith.cmpi ne, %33, %c0_i32_17 : i32
    scf.if %34 {
      %c128_i32_18 = arith.constant 128 : i32
      %35 = arith.muli %arg0, %c128_i32_18 : i32
      %36 = tpu.assume_multiple %35, 128 : i32
      %37 = arith.index_cast %36 : i32 to index
      %c0_19 = arith.constant 0 : index
      %38 = vector.load %arg5[%37, %c0_19] : memref<128x128xf32, #tpu.memory_space<vmem>>, vector<128x128xf32>
      %c0_20 = arith.constant 0 : index
      %c0_21 = arith.constant 0 : index
      %39 = vector.load %arg6[%c0_20, %c0_21] : memref<128x128xf32, #tpu.memory_space<vmem>>, vector<128x128xf32>
      %cst_22 = arith.constant dense<0.000000e+00> : vector<128x128xf32>
      %40 = tpu.matmul %38, %39, %cst_22 {dimension_numbers = #tpu.dot_dimension_numbers<[1], [0], [0], [1], [0, 0, 1, 1], [], []>} : vector<128x128xf32>, vector<128x128xf32>, vector<128x128xf32> -> vector<128x128xf32>
      %c0_23 = arith.constant 0 : index
      %c0_24 = arith.constant 0 : index
      %41 = vector.load %arg10[%c0_23, %c0_24] : memref<128x128xf32, #tpu.memory_space<vmem>>, vector<128x128xf32>
      %42 = arith.addf %40, %41 : vector<128x128xf32>
      %c0_25 = arith.constant 0 : index
      %c0_26 = arith.constant 0 : index
      %43 = vector.load %arg8[%c0_25, %c0_26] : memref<1x128xf32, #tpu.memory_space<vmem>>, vector<1x128xf32>
      %44 = vector.broadcast %43 : vector<1x128xf32> to vector<128x128xf32>
      %45 = arith.addf %42, %44 : vector<128x128xf32>
      %c0_27 = arith.constant 0 : index
      %c0_28 = arith.constant 0 : index
      %46 = vector.load %arg9[%c0_27, %c0_28] : memref<128x128xf32, #tpu.memory_space<vmem>>, vector<128x128xf32>
      tpu.vector_store %arg9[%c0_27, %c0_28], %45 {strides = array<i32>} : memref<128x128xf32, #tpu.memory_space<vmem>>, vector<128x128xf32>,
    } else {
    }
    return
  }
  func.func @transform_0(%arg0: i32, %arg1: i32) -> (i32, i32) {
    %c0_i32 = arith.constant 0 : i32
    %c0_i32_0 = arith.constant 0 : i32
    return %arg1, %c0_i32 : i32, i32
  }
  func.func @transform_1(%arg0: i32, %arg1: i32) -> (i32, i32) {
    %c0_i32 = arith.constant 0 : i32
    %c0_i32_0 = arith.constant 0 : i32
    return %arg1, %c0_i32 : i32, i32
  }
  func.func @transform_2(%arg0: i32, %arg1: i32) -> (i32, i32) {
    %c0_i32 = arith.constant 0 : i32
    %c0_i32_0 = arith.constant 0 : i32
    return %c0_i32, %arg1 : i32, i32
  }
  func.func @transform_3(%arg0: i32, %arg1: i32) -> (i32, i32) {
    %c0_i32 = arith.constant 0 : i32
    %c0_i32_0 = arith.constant 0 : i32
    %c0_i32_1 = arith.constant 0 : i32
    return %c0_i32, %c0_i32_0 : i32, i32
  }
  func.func @transform_4(%arg0: i32, %arg1: i32) -> (i32, i32) {
    %c0_i32 = arith.constant 0 : i32
    %c0_i32_0 = arith.constant 0 : i32
    %c0_i32_1 = arith.constant 0 : i32
    return %c0_i32, %c0_i32_0 : i32, i32
  }
  func.func @transform_5(%arg0: i32, %arg1: i32) -> (i32, i32) {
    %c0_i32 = arith.constant 0 : i32
    %c0_i32_0 = arith.constant 0 : i32
    %c0_i32_1 = arith.constant 0 : i32
    return %c0_i32, %c0_i32_0 : i32, i32
  }
  func.func @transform_6(%arg0: i32, %arg1: i32) -> (i32, i32) {
    %c0_i32 = arith.constant 0 : i32
    %c0_i32_0 = arith.constant 0 : i32
    %c0_i32_1 = arith.constant 0 : i32
    return %c0_i32, %c0_i32_0 : i32, i32
  }
  func.func @transform_7(%arg0: i32, %arg1: i32) -> (i32, i32) {
    %c0_i32 = arith.constant 0 : i32
    %c0_i32_0 = arith.constant 0 : i32
    return %arg0, %c0_i32 : i32, i32
  }
}

</mosaic_0001>

<bundles_post_ra>
// kernel: tpu_custom_call.1
= control target key start
LH: loop header
LB: loop body
LE: loop exit
PB: predicated region body
PF: predicated region fallthrough
CT: control target
= control target key end

     0   :  { %12 = vsyncpa [#allocation5], 0  ;;  %s1417_s0 = inlined_call_operand.vmem [shape: s32[128,1], index: 0, kind: input, shape index: {}]   ;;  %s1418_s1 = inlined_call_operand.vmem [shape: s32[128,1], index: 1, kind: input, shape index: {}]   ;;  %s1419_s2 = inlined_call_operand.vmem [shape: s32[1,128], index: 2, kind: input, shape index: {}]   ;;  %s1420_s3 = inlined_call_operand.vmem [shape: f32[128,128], index: 3, kind: input, shape index: {}]   ;;  %s1421_s4 = inlined_call_operand.vmem [shape: f32[128,128], index: 4, kind: input, shape index: {}]   ;;  %s1422_s5 = inlined_call_operand.hbm [shape: f32[128,128], index: 5, kind: input, shape index: {}]   ;;  %s1423_s6 = inlined_call_operand.vmem [shape: f32[1,128], index: 6, kind: input, shape index: {}]   ;;  %s1424_s7 = inlined_call_operand.hbm [shape: f32[128,128], index: 7, kind: output, shape index: {}]  }
   0x1   :  { %13 = vsyncpa [#allocation6], 0  ;;  %s28_s26 = sshll.u32 %s1422_s5, 4  ;;  %s965_s27 = smov [#allocation4]   ;;  %s29_s26 = int_to_ptr.hbm [resolvable:$true] %s28_s26 }
   0x2   :  { %s30_s28 = sshll.u32 %s965_s27, 4  ;;  %s966_s29 = smov 128   ;;  %s31_s28 = int_to_ptr.vmem [resolvable:$true] %s30_s28 }
   0x3   :  { %s967_s30 = smov 8  }
   0x4   :  { %36 = dma.hbm_to_vmem [thread:$0]  %s29_s26, 2048, %s31_s28, [#allocation5], %s966_s29, %s966_s29, %s967_s30  }
   0x5   :  { %961 = dma.done.wait [#allocation5], 2048  }
   0x6   :  { %962 = vsyncadd [#allocation5], 4294965248  ;;  %v968_v0 = vmov 0   ;;  %v65_v1 = vld [vmem:[%s1417_s0 + $0x10] sm:$0xff]  ;;  %v64_v2 = vld [vmem:[%s1417_s0 + $0x8] sm:$0xff]  ;;  %v96_v49 = vlaneseq  ;;  %v969_v55 = vmov 0.0  }
   0x7   :  { %910 = vset.pattern.permute.xlu2 %v968_v0  ;;  %909 = vset.pattern.permute.xlu1 %v968_v0  ;;  %v63_v3 = vld [vmem:[%s1417_s0] sm:$0xff]  ;;  %v81_v4 = vld [vmem:[%s1418_s1 + $0x10] sm:$0xff]  ;;  %v80_v5 = vld [vmem:[%s1418_s1 + $0x8] sm:$0xff]  ;;  %s824_s24 = sshll.u32 %s1424_s7, 4  ;;  %s825_s24 = int_to_ptr.hbm [resolvable:$true] %s824_s24 }
   0x8   :  { %908 = vset.pattern.permute.xlu0 %v968_v0  ;;  %105 = vperm.xlu2 %910, %v65_v1   ;;  %v79_v6 = vld [vmem:[%s1418_s1] sm:$0xff]  ;;  %v82_v8 = vld [vmem:[%s1418_s1 + $0x18] sm:$0xff]  ;;  %v84_v10 = vld [vmem:[%s1418_s1 + $0x28] sm:$0xff]  ;;  %v1211_v52 = vand.u32 127, %v96_v49 }
   0x9   :  { %102 = vperm.xlu1 %909, %v64_v2   ;;  %99 = vperm.xlu0 %908, %v63_v3   ;;  %v67_v7 = vld [vmem:[%s1417_s0 + $0x20] sm:$0xff]  ;;  %v66_v9 = vld [vmem:[%s1417_s0 + $0x18] sm:$0xff]  ;;  %v68_v11 = vld [vmem:[%s1417_s0 + $0x28] sm:$0xff] }
   0xa   :  { %v83_v12 = vld [vmem:[%s1418_s1 + $0x20] sm:$0xff]  ;;  %v70_v13 = vld [vmem:[%s1417_s0 + $0x38] sm:$0xff]  ;;  %v85_v14 = vld [vmem:[%s1418_s1 + $0x30] sm:$0xff] }
   0xb   :  { %v69_v15 = vld [vmem:[%s1417_s0 + $0x30] sm:$0xff]  ;;  %v87_v16 = vld [vmem:[%s1418_s1 + $0x40] sm:$0xff]  ;;  %v86_v18 = vld [vmem:[%s1418_s1 + $0x38] sm:$0xff] }
   0xc   :  { %v71_v17 = vld [vmem:[%s1417_s0 + $0x40] sm:$0xff]  ;;  %v73_v19 = vld [vmem:[%s1417_s0 + $0x50] sm:$0xff]  ;;  %v88_v20 = vld [vmem:[%s1418_s1 + $0x48] sm:$0xff] }
   0xd   :  { %v72_v21 = vld [vmem:[%s1417_s0 + $0x48] sm:$0xff]  ;;  %v90_v22 = vld [vmem:[%s1418_s1 + $0x58] sm:$0xff]  ;;  %v89_v24 = vld [vmem:[%s1418_s1 + $0x50] sm:$0xff] }
   0xe   :  { %v74_v23 = vld [vmem:[%s1417_s0 + $0x58] sm:$0xff]  ;;  %v1098_v26 = vld [vmem:[%s1420_s3 + $0x70] sm:$0xff]  ;;  %v76_v27 = vld [vmem:[%s1417_s0 + $0x68] sm:$0xff] }
   0xf   :  { %v1093_v25 = vld [vmem:[%s1420_s3 + $0x78] sm:$0xff]  ;;  %v91_v28 = vld [vmem:[%s1418_s1 + $0x60] sm:$0xff]  ;;  %v1114_v30 = vld [vmem:[%s1420_s3 + $0x68] sm:$0xff] }
  0x10   :  { %201 = vperm.xlu2 %910, %v81_v4   ;;  %322 = vmatpush.msra.mxu0 %v1093_v25  ;;  %v75_v29 = vld [vmem:[%s1417_s0 + $0x60] sm:$0xff]  ;;  %v93_v32 = vld [vmem:[%s1418_s1 + $0x70] sm:$0xff]  ;;  %v92_v34 = vld [vmem:[%s1418_s1 + $0x68] sm:$0xff] }
  0x11   :  { %198 = vperm.xlu1 %909, %v80_v5   ;;  %195 = vperm.xlu0 %908, %v79_v6   ;;  %v1119_v31 = vld [vmem:[%s1420_s3 + $0x60] sm:$0xff]  ;;  %v77_v33 = vld [vmem:[%s1417_s0 + $0x70] sm:$0xff]  ;;  %v1134_v35 = vld [vmem:[%s1420_s3 + $0x58] sm:$0xff] }
  0x12   :  { %323 = vmatpush.msra.mxu0 %v1098_v26  ;;  %v1140_v36 = vld [vmem:[%s1420_s3 + $0x50] sm:$0xff]  ;;  %v1147_v37 = vld [vmem:[%s1420_s3 + $0x48] sm:$0xff]  ;;  %v1152_v38 = vld [vmem:[%s1420_s3 + $0x40] sm:$0xff] }
  0x13   :  { %v94_v39 = vld [vmem:[%s1418_s1 + $0x78] sm:$0xff]  ;;  %v1170_v42 = vld [vmem:[%s1420_s3 + $0x30] sm:$0xff]  ;;  %v1177_v43 = vld [vmem:[%s1420_s3 + $0x28] sm:$0xff] }
  0x14   :  { %324 = vmatpush.msra.mxu0 %v1114_v30  ;;  %v78_v40 = vld [vmem:[%s1417_s0 + $0x78] sm:$0xff]  ;;  %v1183_v44 = vld [vmem:[%s1420_s3 + $0x20] sm:$0xff]  ;;  %v1194_v46 = vld [vmem:[%s1420_s3 + $0x10] sm:$0xff] }
  0x15   :  { %v1164_v41 = vld [vmem:[%s1420_s3 + $0x38] sm:$0xff]  ;;  %v1201_v47 = vld [vmem:[%s1420_s3 + $0x8] sm:$0xff]  ;;  %v1207_v48 = vld [vmem:[%s1420_s3] sm:$0xff] }
  0x16   :  { %325 = vmatpush.msra.mxu0 %v1119_v31  ;;  %v1188_v45 = vld [vmem:[%s1420_s3 + $0x18] sm:$0xff] }
  0x18   :  { %111 = vperm.xlu2 %910, %v67_v7   ;;  %326 = vmatpush.msra.mxu0 %v1134_v35 }
  0x19   :  { %204 = vperm.xlu1 %909, %v82_v8   ;;  %108 = vperm.xlu0 %908, %v66_v9  }
  0x1a   :  { %327 = vmatpush.msra.mxu0 %v1140_v36 }
  0x1c   :  { %328 = vmatpush.msra.mxu0 %v1147_v37 }
  0x1e   :  { %329 = vmatpush.msra.mxu0 %v1152_v38 }
  0x20   :  { %210 = vperm.xlu2 %910, %v84_v10   ;;  %330 = vmatpush.msra.mxu0 %v1164_v41 }
  0x21   :  { %114 = vperm.xlu1 %909, %v68_v11   ;;  %207 = vperm.xlu0 %908, %v83_v12  }
  0x22   :  { %331 = vmatpush.msra.mxu0 %v1170_v42 }
  0x24   :  { %332 = vmatpush.msra.mxu0 %v1177_v43 }
  0x26   :  { %333 = vmatpush.msra.mxu0 %v1183_v44 }
  0x28   :  { %120 = vperm.xlu2 %910, %v70_v13   ;;  %334 = vmatpush.msra.mxu0 %v1188_v45 }
  0x29   :  { %213 = vperm.xlu1 %909, %v85_v14   ;;  %117 = vperm.xlu0 %908, %v69_v15  }
  0x2a   :  { %335 = vmatpush.msra.mxu0 %v1194_v46 }
  0x2c   :  { %336 = vmatpush.msra.mxu0 %v1201_v47 }
  0x2e   :  { %337 = vmatpush.msra.mxu0 %v1207_v48 }
  0x30   :  { %219 = vperm.xlu2 %910, %v87_v16  }
  0x31   :  { %123 = vperm.xlu1 %909, %v71_v17   ;;  %216 = vperm.xlu0 %908, %v86_v18  }
  0x38   :  { %129 = vperm.xlu2 %910, %v73_v19  }
  0x39   :  { %222 = vperm.xlu1 %909, %v88_v20   ;;  %126 = vperm.xlu0 %908, %v72_v21  }
  0x40   :  { %228 = vperm.xlu2 %910, %v90_v22  }
  0x41   :  { %132 = vperm.xlu1 %909, %v74_v23   ;;  %225 = vperm.xlu0 %908, %v89_v24  }
  0x48   :  { %138 = vperm.xlu2 %910, %v76_v27  }
  0x49   :  { %231 = vperm.xlu1 %909, %v91_v28   ;;  %135 = vperm.xlu0 %908, %v75_v29  }
  0x50   :  { %237 = vperm.xlu2 %910, %v93_v32  }
  0x51   :  { %141 = vperm.xlu1 %909, %v77_v33   ;;  %234 = vperm.xlu0 %908, %v92_v34   ;;  %v402_v34 = vld [vmem:[#allocation4 + $0x78] sm:$0xff] }
  0x52   :  { %403 = vmatpush.msra.mxu1 %v402_v34 }
  0x59   :  { %240 = vperm.xlu1 %909, %v94_v39   ;;  %144 = vperm.xlu0 %908, %v78_v40  }
  0x62   :  { %v106_v54 = vpop.permute.xlu2 %105 }
  0x63   :  { %vm148_vm4 = vcmp.eq.s32.totalorder %v1211_v52, %v106_v54  ;;  %v401_v54 = vld [vmem:[#allocation4 + $0x70] sm:$0xff] }
  0x64   :  { %v839_v0 = vsel %vm148_vm4, 1.0, %v969_v55  ;;  %404 = vmatpush.msra.mxu1 %v401_v54 }
  0x6a   :  { %v202_v63 = vpop.permute.xlu2 %201 }
  0x6b   :  { %vm244_vm5 = vcmp.eq.s32.totalorder %v1211_v52, %v202_v63 }
  0x6c   :  { %v855_v1 = vsel %vm244_vm5, 1.0, %v969_v55 }
  0x6d   :  { %v292_v4 = vsub.f32 %v839_v0, %v855_v1  ;;  %v397_v0 = vld [vmem:[#allocation4 + $0x50] sm:$0xff]  ;;  %v396_v1 = vld [vmem:[#allocation4 + $0x48] sm:$0xff] }
  0x72   :  { %v112_v9 = vpop.permute.xlu2 %111 }
  0x73   :  { %vm150_vm9 = vcmp.eq.s32.totalorder %v1211_v52, %v112_v9  ;;  %v393_v9 = vld [vmem:[#allocation4 + $0x30] sm:$0xff] }
  0x74   :  { %v841_v12 = vsel %vm150_vm9, 1.0, %v969_v55 }
  0x7a   :  { %v211_v14 = vpop.permute.xlu2 %210 }
  0x7b   :  { %v103_v50 = vpop.permute.xlu1 %102  ;;  %v100_v51 = vpop.permute.xlu0 %99  ;;  %vm247_vm11 = vcmp.eq.s32.totalorder %v1211_v52, %v211_v14  ;;  %v390_v14 = vld [vmem:[#allocation4 + $0x18] sm:$0xff] }
  0x7c   :  { %vm146_vm0 = vcmp.eq.s32.totalorder %v1211_v52, %v100_v51  ;;  %vm147_vm2 = vcmp.eq.s32.totalorder %v1211_v52, %v103_v50  ;;  %v858_v17 = vsel %vm247_vm11, 1.0, %v969_v55 }
  0x7d   :  { %v837_v56 = vsel %vm146_vm0, 1.0, %v969_v55  ;;  %v838_v60 = vsel %vm147_vm2, 1.0, %v969_v55 }
  0x82   :  { %v121_v22 = vpop.permute.xlu2 %120 }
  0x83   :  { %v196_v53 = vpop.permute.xlu0 %195  ;;  %v199_v57 = vpop.permute.xlu1 %198  ;;  %vm153_vm15 = vcmp.eq.s32.totalorder %v1211_v52, %v121_v22  ;;  %v387_v22 = vld [vmem:[#allocation4] sm:$0xff] }
  0x84   :  { %vm242_vm1 = vcmp.eq.s32.totalorder %v1211_v52, %v196_v53  ;;  %vm243_vm3 = vcmp.eq.s32.totalorder %v1211_v52, %v199_v57  ;;  %v844_v29 = vsel %vm153_vm15, 1.0, %v969_v55  ;;  %v399_v57 = vld [vmem:[#allocation4 + $0x60] sm:$0xff] }
  0x85   :  { %v853_v58 = vsel %vm242_vm1, 1.0, %v969_v55  ;;  %v854_v61 = vsel %vm243_vm3, 1.0, %v969_v55 }
  0x86   :  { %v290_v59 = vsub.f32 %v837_v56, %v853_v58  ;;  %v291_v62 = vsub.f32 %v838_v60, %v854_v61  ;;  %v400_v56 = vld [vmem:[#allocation4 + $0x68] sm:$0xff]  ;;  %v398_v60 = vld [vmem:[#allocation4 + $0x58] sm:$0xff] }
  0x87   :  { %405 = vmatpush.msra.mxu1 %v400_v56 }
  0x88   :  { %338 = vmatmul.f32.vlgmr.msra.gmra.mxu0 %v290_v59 }
  0x89   :  { %406 = vmatpush.msra.mxu1 %v399_v57 }
  0x8a   :  { %v220_v33 = vpop.permute.xlu2 %219 }
  0x8b   :  { %v109_v2 = vpop.permute.xlu0 %108  ;;  %v205_v3 = vpop.permute.xlu1 %204  ;;  %vm250_vm1 = vcmp.eq.s32.totalorder %v1211_v52, %v220_v33  ;;  %407 = vmatpush.msra.mxu1 %v398_v60 }
  0x8c   :  { %vm245_vm6 = vcmp.eq.s32.totalorder %v1211_v52, %v205_v3  ;;  %vm149_vm7 = vcmp.eq.s32.totalorder %v1211_v52, %v109_v2  ;;  %v861_v50 = vsel %vm250_vm1, 1.0, %v969_v55  ;;  %v395_v2 = vld [vmem:[#allocation4 + $0x40] sm:$0xff] }
  0x8d   :  { %v856_v5 = vsel %vm245_vm6, 1.0, %v969_v55  ;;  %v840_v6 = vsel %vm149_vm7, 1.0, %v969_v55  ;;  %408 = vmatpush.msra.mxu1 %v397_v0 }
  0x8e   :  { %v293_v8 = vsub.f32 %v840_v6, %v856_v5  ;;  %v394_v5 = vld [vmem:[#allocation4 + $0x38] sm:$0xff] }
  0x8f   :  { %409 = vmatpush.msra.mxu1 %v396_v1 }
  0x90   :  { %341 = vmatmul.f32.gmra.mxu0 %v291_v62 }
  0x91   :  { %410 = vmatpush.msra.mxu1 %v395_v2 }
  0x92   :  { %v130_v61 = vpop.permute.xlu2 %129 }
  0x93   :  { %v208_v7 = vpop.permute.xlu0 %207  ;;  %v115_v10 = vpop.permute.xlu1 %114  ;;  %vm156_vm5 = vcmp.eq.s32.totalorder %v1211_v52, %v130_v61  ;;  %411 = vmatpush.msra.mxu1 %v394_v5 }
  0x94   :  { %vm246_vm8 = vcmp.eq.s32.totalorder %v1211_v52, %v208_v7  ;;  %vm151_vm10 = vcmp.eq.s32.totalorder %v1211_v52, %v115_v10  ;;  %v847_v6 = vsel %vm156_vm5, 1.0, %v969_v55  ;;  %v392_v10 = vld [vmem:[#allocation4 + $0x28] sm:$0xff] }
  0x95   :  { %v857_v11 = vsel %vm246_vm8, 1.0, %v969_v55  ;;  %v842_v15 = vsel %vm151_vm10, 1.0, %v969_v55  ;;  %412 = vmatpush.msra.mxu1 %v393_v9 }
  0x96   :  { %v294_v13 = vsub.f32 %v841_v12, %v857_v11  ;;  %v295_v19 = vsub.f32 %v842_v15, %v858_v17  ;;  %v391_v11 = vld [vmem:[#allocation4 + $0x20] sm:$0xff] }
  0x97   :  { %413 = vmatpush.msra.mxu1 %v392_v10 }
  0x98   :  { %344 = vmatmul.f32.gmra.mxu0 %v292_v4 }
  0x99   :  { %414 = vmatpush.msra.mxu1 %v391_v11 }
  0x9b   :  { %v118_v16 = vpop.permute.xlu0 %117  ;;  %v214_v18 = vpop.permute.xlu1 %213  ;;  %415 = vmatpush.msra.mxu1 %v390_v14 }
  0x9c   :  { %vm248_vm12 = vcmp.eq.s32.totalorder %v1211_v52, %v214_v18  ;;  %vm152_vm13 = vcmp.eq.s32.totalorder %v1211_v52, %v118_v16  ;;  %v389_v18 = vld [vmem:[#allocation4 + $0x10] sm:$0xff] }
  0x9d   :  { %v859_v20 = vsel %vm248_vm12, 1.0, %v969_v55  ;;  %v843_v21 = vsel %vm152_vm13, 1.0, %v969_v55  ;;  %416 = vmatpush.msra.mxu1 %v389_v18 }
  0x9e   :  { %v296_v24 = vsub.f32 %v843_v21, %v859_v20 }
  0xa0   :  { %347 = vmatmul.f32.gmra.mxu0 %v293_v8  ;;  %v229_v8 = vpop.permute.xlu2 %228 }
  0xa1   :  { %vm253_vm7 = vcmp.eq.s32.totalorder %v1211_v52, %v229_v8 }
  0xa2   :  { %v864_v15 = vsel %vm253_vm7, 1.0, %v969_v55 }
  0xa3   :  { %v217_v23 = vpop.permute.xlu0 %216  ;;  %v124_v27 = vpop.permute.xlu1 %123 }
  0xa4   :  { %vm249_vm14 = vcmp.eq.s32.totalorder %v1211_v52, %v217_v23  ;;  %vm154_vm0 = vcmp.eq.s32.totalorder %v1211_v52, %v124_v27 }
  0xa5   :  { %v860_v28 = vsel %vm249_vm14, 1.0, %v969_v55  ;;  %v845_v39 = vsel %vm154_vm0, 1.0, %v969_v55 }
  0xa6   :  { %v297_v32 = vsub.f32 %v844_v29, %v860_v28  ;;  %v298_v53 = vsub.f32 %v845_v39, %v861_v50 }
  0xa8   :  { %350 = vmatmul.f32.gmra.mxu0 %v294_v13  ;;  %v139_v23 = vpop.permute.xlu2 %138 }
  0xa9   :  { %vm159_vm11 = vcmp.eq.s32.totalorder %v1211_v52, %v139_v23  ;;  %v697_v23 = vld [vmem:[%s1421_s4 + $0x60] sm:$0xff] }
  0xab   :  { %v127_v40 = vpop.permute.xlu0 %126  ;;  %v223_v51 = vpop.permute.xlu1 %222 }
  0xac   :  { %vm251_vm2 = vcmp.eq.s32.totalorder %v1211_v52, %v223_v51  ;;  %vm155_vm3 = vcmp.eq.s32.totalorder %v1211_v52, %v127_v40 }
  0xad   :  { %v862_v58 = vsel %vm251_vm2, 1.0, %v969_v55  ;;  %v846_v59 = vsel %vm155_vm3, 1.0, %v969_v55 }
  0xae   :  { %v299_v63 = vsub.f32 %v846_v59, %v862_v58 }
  0xb0   :  { %353 = vmatmul.f32.gmra.mxu0 %v295_v19  ;;  %v388_v19 = vld [vmem:[#allocation4 + $0x8] sm:$0xff]  ;;  %v238_v34 = vpop.permute.xlu2 %237 }
  0xb1   :  { %417 = vmatpush.msra.mxu1 %v388_v19  ;;  %vm256_vm13 = vcmp.eq.s32.totalorder %v1211_v52, %v238_v34  ;;  %v692_v34 = vld [vmem:[%s1421_s4 + $0x38] sm:$0xff] }
  0xb2   :  { %v867_v40 = vsel %vm256_vm13, 1.0, %v969_v55 }
  0xb3   :  { %v226_v62 = vpop.permute.xlu0 %225  ;;  %v133_v3 = vpop.permute.xlu1 %132  ;;  %418 = vmatpush.msra.mxu1 %v387_v22  ;;  %v698_v22 = vld [vmem:[%s1421_s4 + $0x68] sm:$0xff] }
  0xb4   :  { %vm252_vm4 = vcmp.eq.s32.totalorder %v1211_v52, %v226_v62  ;;  %vm157_vm6 = vcmp.eq.s32.totalorder %v1211_v52, %v133_v3 }
  0xb5   :  { %v863_v4 = vsel %vm252_vm4, 1.0, %v969_v55  ;;  %v848_v12 = vsel %vm157_vm6, 1.0, %v969_v55 }
  0xb6   :  { %v300_v7 = vsub.f32 %v847_v6, %v863_v4  ;;  %v301_v17 = vsub.f32 %v848_v12, %v864_v15 }
  0xb8   :  { %356 = vmatmul.f32.gmra.mxu0 %v296_v24 }
  0xbb   :  { %v136_v13 = vpop.permute.xlu0 %135  ;;  %v232_v16 = vpop.permute.xlu1 %231 }
  0xbc   :  { %vm254_vm8 = vcmp.eq.s32.totalorder %v1211_v52, %v232_v16  ;;  %vm158_vm9 = vcmp.eq.s32.totalorder %v1211_v52, %v136_v13 }
  0xbd   :  { %v865_v20 = vsel %vm254_vm8, 1.0, %v969_v55  ;;  %v849_v21 = vsel %vm158_vm9, 1.0, %v969_v55 }
  0xbe   :  { %v302_v27 = vsub.f32 %v849_v21, %v865_v20  ;;  %v700_v20 = vld [vmem:[%s1421_s4 + $0x78] sm:$0xff]  ;;  %v699_v21 = vld [vmem:[%s1421_s4 + $0x70] sm:$0xff] }
  0xbf   :  { %717 = vmatpush.msra.mxu3 %v700_v20 }
  0xc0   :  { %359 = vmatmul.f32.gmra.mxu0 %v297_v32  ;;  %v850_v32 = vsel %vm159_vm11, 1.0, %v969_v55 }
  0xc1   :  { %718 = vmatpush.msra.mxu3 %v699_v21 }
  0xc3   :  { %v235_v24 = vpop.permute.xlu0 %234  ;;  %v142_v28 = vpop.permute.xlu1 %141  ;;  %719 = vmatpush.msra.mxu3 %v698_v22 }
  0xc4   :  { %vm255_vm10 = vcmp.eq.s32.totalorder %v1211_v52, %v235_v24  ;;  %vm160_vm12 = vcmp.eq.s32.totalorder %v1211_v52, %v142_v28  ;;  %v695_v28 = vld [vmem:[%s1421_s4 + $0x50] sm:$0xff] }
  0xc5   :  { %v866_v29 = vsel %vm255_vm10, 1.0, %v969_v55  ;;  %v851_v39 = vsel %vm160_vm12, 1.0, %v969_v55  ;;  %720 = vmatpush.msra.mxu3 %v697_v23 }
  0xc6   :  { %v303_v33 = vsub.f32 %v850_v32, %v866_v29  ;;  %v694_v29 = vld [vmem:[%s1421_s4 + $0x48] sm:$0xff]  ;;  %v693_v32 = vld [vmem:[%s1421_s4 + $0x40] sm:$0xff] }
  0xc8   :  { %362 = vmatmul.f32.gmra.mxu0 %v298_v53  ;;  %v304_v53 = vsub.f32 %v851_v39, %v867_v40  ;;  %v691_v39 = vld [vmem:[%s1421_s4 + $0x30] sm:$0xff]  ;;  %v690_v40 = vld [vmem:[%s1421_s4 + $0x28] sm:$0xff] }
  0xcb   :  { %v241_v50 = vpop.permute.xlu1 %240  ;;  %v145_v51 = vpop.permute.xlu0 %144 }
  0xcc   :  { %vm257_vm14 = vcmp.eq.s32.totalorder %v1211_v52, %v241_v50  ;;  %vm161_vm15 = vcmp.eq.s32.totalorder %v1211_v52, %v145_v51  ;;  %v689_v50 = vld [vmem:[%s1421_s4 + $0x20] sm:$0xff] }
  0xcd   :  { %v868_v54 = vsel %vm257_vm14, 1.0, %v969_v55  ;;  %v852_v56 = vsel %vm161_vm15, 1.0, %v969_v55 }
  0xce   :  { %v305_v57 = vsub.f32 %v852_v56, %v868_v54  ;;  %v687_v54 = vld [vmem:[%s1421_s4 + $0x10] sm:$0xff]  ;;  %v686_v56 = vld [vmem:[%s1421_s4 + $0x8] sm:$0xff] }
  0xd0   :  { %365 = vmatmul.f32.gmra.mxu0 %v299_v63 }
  0xd8   :  { %368 = vmatmul.f32.gmra.mxu0 %v300_v7 }
  0xe0   :  { %371 = vmatmul.f32.gmra.mxu0 %v301_v17 }
  0xe8   :  { %374 = vmatmul.f32.gmra.mxu0 %v302_v27  ;;  %v696_v27 = vld [vmem:[%s1421_s4 + $0x58] sm:$0xff] }
  0xe9   :  { %721 = vmatpush.msra.mxu3 %v696_v27 }
  0xeb   :  { %722 = vmatpush.msra.mxu3 %v695_v28 }
  0xed   :  { %723 = vmatpush.msra.mxu3 %v694_v29 }
  0xef   :  { %724 = vmatpush.msra.mxu3 %v693_v32 }
  0xf0   :  { %377 = vmatmul.f32.gmra.mxu0 %v303_v33 }
  0xf1   :  { %725 = vmatpush.msra.mxu3 %v692_v34 }
  0xf3   :  { %726 = vmatpush.msra.mxu3 %v691_v39 }
  0xf5   :  { %727 = vmatpush.msra.mxu3 %v690_v40 }
  0xf7   :  { %728 = vmatpush.msra.mxu3 %v689_v50 }
  0xf8   :  { %380 = vmatmul.f32.gmra.mxu0 %v304_v53  ;;  %v688_v53 = vld [vmem:[%s1421_s4 + $0x18] sm:$0xff] }
  0xf9   :  { %729 = vmatpush.msra.mxu3 %v688_v53 }
  0xfb   :  { %730 = vmatpush.msra.mxu3 %v687_v54 }
  0xfd   :  { %731 = vmatpush.msra.mxu3 %v686_v56 }
 0x100   :  { %383 = vmatmul.f32.gmra.mxu0 %v305_v57  ;;  %v685_v57 = vld [vmem:[%s1421_s4] sm:$0xff] }
 0x101   :  { %732 = vmatpush.msra.mxu3 %v685_v57 }
 0x102   :  { %733 = vmatmul.f32.vlgmr.msra.gmra.mxu3 %v1207_v48  ;;  %v1336_v48 = vshrl.u32 %v96_v49, 7 }
 0x104   :  { %v471_v49 = vadd.s32 16, %v1336_v48 }
 0x105   :  { %v339_v58 = vpop.f32.mrf.mxu0 }
 0x106   :  { %419 = vmatmul.f32.vlgmr.msra.gmra.mxu1 %v339_v58 }
 0x10a   :  { %736 = vmatmul.f32.gmra.mxu3 %v1201_v47  ;;  %v1341_v47 = vld [vmem:[%s1419_s2] ss:$0 sm:$0xff] }
 0x10b   :  { %vm504_vm0 = vcmp.eq.s32.totalorder %v1336_v48, %v1341_v47  ;;  %vm506_vm2 = vcmp.eq.s32.totalorder %v471_v49, %v1341_v47 }
 0x10d   :  { %v342_v59 = vpop.f32.mrf.mxu0 }
 0x10e   :  { %422 = vmatmul.f32.gmra.mxu1 %v342_v59  ;;  %v472_v59 = vadd.s32 24, %v1336_v48 }
 0x110   :  { %vm507_vm3 = vcmp.eq.s32.totalorder %v472_v59, %v1341_v47 }
 0x112   :  { %739 = vmatmul.f32.gmra.mxu3 %v1194_v46  ;;  %v970_v46 = vmov 1.0  }
 0x115   :  { %v345_v60 = vpop.f32.mrf.mxu0 }
 0x116   :  { %425 = vmatmul.f32.gmra.mxu1 %v345_v60 }
 0x11a   :  { %742 = vmatmul.f32.gmra.mxu3 %v1188_v45  ;;  %v470_v45 = vadd.s32 8, %v1336_v48 }
 0x11c   :  { %vm505_vm1 = vcmp.eq.s32.totalorder %v470_v45, %v1341_v47 }
 0x11d   :  { %v348_v61 = vpop.f32.mrf.mxu0 }
 0x11e   :  { %428 = vmatmul.f32.gmra.mxu1 %v348_v61 }
 0x122   :  { %745 = vmatmul.f32.gmra.mxu3 %v1183_v44  ;;  %v473_v44 = vadd.s32 32, %v1336_v48 }
 0x124   :  { %vm508_vm4 = vcmp.eq.s32.totalorder %v473_v44, %v1341_v47 }
 0x125   :  { %v351_v62 = vpop.f32.mrf.mxu0 }
 0x126   :  { %431 = vmatmul.f32.gmra.mxu1 %v351_v62  ;;  %v484_v62 = vadd.s32 120, %v1336_v48 }
 0x128   :  { %vm519_vm15 = vcmp.eq.s32.totalorder %v484_v62, %v1341_v47 }
 0x12a   :  { %748 = vmatmul.f32.gmra.mxu3 %v1177_v43  ;;  %v474_v43 = vadd.s32 40, %v1336_v48 }
 0x12c   :  { %vm509_vm5 = vcmp.eq.s32.totalorder %v474_v43, %v1341_v47 }
 0x12d   :  { %v354_v63 = vpop.f32.mrf.mxu0 }
 0x12e   :  { %434 = vmatmul.f32.gmra.mxu1 %v354_v63 }
 0x132   :  { %751 = vmatmul.f32.gmra.mxu3 %v1170_v42  ;;  %v475_v42 = vadd.s32 48, %v1336_v48 }
 0x134   :  { %vm510_vm6 = vcmp.eq.s32.totalorder %v475_v42, %v1341_v47 }
 0x135   :  { %v357_v52 = vpop.f32.mrf.mxu0 }
 0x136   :  { %437 = vmatmul.f32.gmra.mxu1 %v357_v52  ;;  %v1393_v52 = vld [vmem:[%s1423_s6] ss:$0 sm:$0xff]  ;;  %s971_s6 = smov [#allocation7]  }
 0x137   :  { %s822_s21 = sshll.u32 %s971_s6, 4  ;;  %s823_s21 = int_to_ptr.vmem [resolvable:$true] %s822_s21 }
 0x13a   :  { %754 = vmatmul.f32.gmra.mxu3 %v1164_v41  ;;  %v476_v41 = vadd.s32 56, %v1336_v48 }
 0x13c   :  { %vm511_vm7 = vcmp.eq.s32.totalorder %v476_v41, %v1341_v47 }
 0x13d   :  { %v360_v0 = vpop.f32.mrf.mxu0 }
 0x13e   :  { %440 = vmatmul.f32.gmra.mxu1 %v360_v0 }
 0x142   :  { %757 = vmatmul.f32.gmra.mxu3 %v1152_v38  ;;  %v477_v38 = vadd.s32 64, %v1336_v48 }
 0x144   :  { %vm512_vm8 = vcmp.eq.s32.totalorder %v477_v38, %v1341_v47 }
 0x145   :  { %v363_v1 = vpop.f32.mrf.mxu0 }
 0x146   :  { %443 = vmatmul.f32.gmra.mxu1 %v363_v1 }
 0x14a   :  { %760 = vmatmul.f32.gmra.mxu3 %v1147_v37  ;;  %v478_v37 = vadd.s32 72, %v1336_v48 }
 0x14c   :  { %vm513_vm9 = vcmp.eq.s32.totalorder %v478_v37, %v1341_v47 }
 0x14d   :  { %v366_v55 = vpop.f32.mrf.mxu0 }
 0x14e   :  { %446 = vmatmul.f32.gmra.mxu1 %v366_v55 }
 0x152   :  { %763 = vmatmul.f32.gmra.mxu3 %v1140_v36  ;;  %v479_v36 = vadd.s32 80, %v1336_v48 }
 0x154   :  { %vm514_vm10 = vcmp.eq.s32.totalorder %v479_v36, %v1341_v47 }
 0x155   :  { %v369_v2 = vpop.f32.mrf.mxu0 }
 0x156   :  { %449 = vmatmul.f32.gmra.mxu1 %v369_v2 }
 0x15a   :  { %766 = vmatmul.f32.gmra.mxu3 %v1134_v35  ;;  %v480_v35 = vadd.s32 88, %v1336_v48 }
 0x15c   :  { %vm515_vm11 = vcmp.eq.s32.totalorder %v480_v35, %v1341_v47 }
 0x15d   :  { %v372_v3 = vpop.f32.mrf.mxu0 }
 0x15e   :  { %452 = vmatmul.f32.gmra.mxu1 %v372_v3 }
 0x162   :  { %769 = vmatmul.f32.gmra.mxu3 %v1119_v31  ;;  %v481_v31 = vadd.s32 96, %v1336_v48 }
 0x164   :  { %vm516_vm12 = vcmp.eq.s32.totalorder %v481_v31, %v1341_v47 }
 0x165   :  { %v375_v4 = vpop.f32.mrf.mxu0 }
 0x166   :  { %455 = vmatmul.f32.gmra.mxu1 %v375_v4 }
 0x16a   :  { %772 = vmatmul.f32.gmra.mxu3 %v1114_v30  ;;  %v482_v30 = vadd.s32 104, %v1336_v48 }
 0x16c   :  { %vm517_vm13 = vcmp.eq.s32.totalorder %v482_v30, %v1341_v47 }
 0x16d   :  { %v378_v5 = vpop.f32.mrf.mxu0 }
 0x16e   :  { %458 = vmatmul.f32.gmra.mxu1 %v378_v5 }
 0x172   :  { %775 = vmatmul.f32.gmra.mxu3 %v1098_v26  ;;  %v483_v26 = vadd.s32 112, %v1336_v48 }
 0x174   :  { %vm518_vm14 = vcmp.eq.s32.totalorder %v483_v26, %v1341_v47 }
 0x175   :  { %v381_v6 = vpop.f32.mrf.mxu0 }
 0x176   :  { %461 = vmatmul.f32.gmra.mxu1 %v381_v6 }
 0x17a   :  { %778 = vmatmul.f32.gmra.mxu3 %v1093_v25 }
 0x17d   :  { %v384_v7 = vpop.f32.mrf.mxu0 }
 0x17e   :  { %464 = vmatmul.f32.gmra.mxu1 %v384_v7 }
 0x183   :  { %v1277_v8 = vpop.f32.mrf.mxu1 }
 0x185   :  { %v734_v60 = vpop.f32.mrf.mxu3 }
 0x18b   :  { %v1279_v9 = vpop.f32.mrf.mxu1 }
 0x18d   :  { %v737_v61 = vpop.f32.mrf.mxu3 }
 0x193   :  { %v1281_v10 = vpop.f32.mrf.mxu1 }
 0x195   :  { %v740_v25 = vpop.f32.mrf.mxu3 }
 0x19b   :  { %v429_v11 = vpop.f32.mrf.mxu1 }
 0x19d   :  { %v743_v63 = vpop.f32.mrf.mxu3 }
 0x1a3   :  { %v432_v12 = vpop.f32.mrf.mxu1 }
 0x1a5   :  { %v746_v3 = vpop.f32.mrf.mxu3 }
 0x1ab   :  { %v435_v13 = vpop.f32.mrf.mxu1 }
 0x1b3   :  { %v438_v14 = vpop.f32.mrf.mxu1 }
 0x1bb   :  { %v441_v15 = vpop.f32.mrf.mxu1 }
 0x1c3   :  { %v444_v16 = vpop.f32.mrf.mxu1 }
 0x1cb   :  { %v447_v17 = vpop.f32.mrf.mxu1 }
 0x1d3   :  { %v450_v18 = vpop.f32.mrf.mxu1 }
 0x1db   :  { %v453_v19 = vpop.f32.mrf.mxu1 }
 0x1e3   :  { %v456_v24 = vpop.f32.mrf.mxu1 }
 0x1eb   :  { %v459_v33 = vpop.f32.mrf.mxu1 }
 0x1f3   :  { %v462_v51 = vpop.f32.mrf.mxu1 }
 0x1fb   :  { %v465_v58 = vpop.f32.mrf.mxu1 }
 0x1fc   :  { %568 = vmatpush.msra.mxu2 %v465_v58 }
 0x1fe   :  { %569 = vmatpush.msra.mxu2 %v462_v51 }
 0x200   :  { %570 = vmatpush.msra.mxu2 %v459_v33 }
 0x202   :  { %571 = vmatpush.msra.mxu2 %v456_v24 }
 0x204   :  { %572 = vmatpush.msra.mxu2 %v453_v19 }
 0x206   :  { %573 = vmatpush.msra.mxu2 %v450_v18 }
 0x208   :  { %574 = vmatpush.msra.mxu2 %v447_v17 }
 0x20a   :  { %575 = vmatpush.msra.mxu2 %v444_v16 }
 0x20c   :  { %576 = vmatpush.msra.mxu2 %v441_v15 }
 0x20e   :  { %577 = vmatpush.msra.mxu2 %v438_v14 }
 0x210   :  { %578 = vmatpush.msra.mxu2 %v435_v13 }
 0x212   :  { %579 = vmatpush.msra.mxu2 %v432_v12 }
 0x214   :  { %580 = vmatpush.msra.mxu2 %v429_v11 }
 0x216   :  { %581 = vmatpush.msra.mxu2 %v1281_v10 }
 0x218   :  { %582 = vmatpush.msra.mxu2 %v1279_v9 }
 0x21a   :  { %583 = vmatpush.msra.mxu2 %v1277_v8  ;;  %v749_v8 = vpop.f32.mrf.mxu3 }
 0x21b   :  { %885 = vmatmul.msk.f32.vlgmr.msra.gmra.mxu2 %vm504_vm0, %v970_v46 }
 0x222   :  { %v752_v13 = vpop.f32.mrf.mxu3 }
 0x223   :  { %886 = vmatmul.msk.f32.gmra.mxu2 %vm505_vm1, %v970_v46 }
 0x22a   :  { %v755_v17 = vpop.f32.mrf.mxu3 }
 0x22b   :  { %887 = vmatmul.msk.f32.gmra.mxu2 %vm506_vm2, %v970_v46 }
 0x232   :  { %v758_v22 = vpop.f32.mrf.mxu3 }
 0x233   :  { %888 = vmatmul.msk.f32.gmra.mxu2 %vm507_vm3, %v970_v46 }
 0x23a   :  { %v761_v29 = vpop.f32.mrf.mxu3 }
 0x23b   :  { %889 = vmatmul.msk.f32.gmra.mxu2 %vm508_vm4, %v970_v46 }
 0x242   :  { %v764_v40 = vpop.f32.mrf.mxu3 }
 0x243   :  { %890 = vmatmul.msk.f32.gmra.mxu2 %vm509_vm5, %v970_v46 }
 0x24a   :  { %v767_v54 = vpop.f32.mrf.mxu3 }
 0x24b   :  { %891 = vmatmul.msk.f32.gmra.mxu2 %vm510_vm6, %v970_v46 }
 0x252   :  { %v770_v47 = vpop.f32.mrf.mxu3 }
 0x253   :  { %892 = vmatmul.msk.f32.gmra.mxu2 %vm511_vm7, %v970_v46 }
 0x25a   :  { %v773_v44 = vpop.f32.mrf.mxu3 }
 0x25b   :  { %893 = vmatmul.msk.f32.gmra.mxu2 %vm512_vm8, %v970_v46 }
 0x262   :  { %v776_v37 = vpop.f32.mrf.mxu3 }
 0x263   :  { %894 = vmatmul.msk.f32.gmra.mxu2 %vm513_vm9, %v970_v46 }
 0x26a   :  { %v779_v30 = vpop.f32.mrf.mxu3 }
 0x26b   :  { %895 = vmatmul.msk.f32.gmra.mxu2 %vm514_vm10, %v970_v46 }
 0x273   :  { %896 = vmatmul.msk.f32.gmra.mxu2 %vm515_vm11, %v970_v46 }
 0x27b   :  { %897 = vmatmul.msk.f32.gmra.mxu2 %vm516_vm12, %v970_v46 }
 0x283   :  { %898 = vmatmul.msk.f32.gmra.mxu2 %vm517_vm13, %v970_v46 }
 0x28b   :  { %899 = vmatmul.msk.f32.gmra.mxu2 %vm518_vm14, %v970_v46 }
 0x293   :  { %900 = vmatmul.msk.f32.gmra.mxu2 %vm519_vm15, %v970_v46 }
 0x29e   :  { %v585_v0 = vpop.f32.mrf.mxu2 }
 0x29f   :  { %v735_v1 = vadd.f32 %v734_v60, %v585_v0 }
 0x2a1   :  { %v786_v55 = vadd.f32 %v1393_v52, %v735_v1 }
 0x2a3   :  { %802 = vst [vmem:[#allocation7] sm:$0xff] %v786_v55 }
 0x2a6   :  { %v588_v2 = vpop.f32.mrf.mxu2 }
 0x2a7   :  { %v738_v4 = vadd.f32 %v737_v61, %v588_v2 }
 0x2a9   :  { %v787_v5 = vadd.f32 %v1393_v52, %v738_v4 }
 0x2ab   :  { %803 = vst [vmem:[#allocation7 + $0x8] sm:$0xff] %v787_v5 }
 0x2ae   :  { %v591_v6 = vpop.f32.mrf.mxu2 }
 0x2af   :  { %v741_v7 = vadd.f32 %v740_v25, %v591_v6 }
 0x2b1   :  { %v788_v9 = vadd.f32 %v1393_v52, %v741_v7 }
 0x2b3   :  { %804 = vst [vmem:[#allocation7 + $0x10] sm:$0xff] %v788_v9 }
 0x2b6   :  { %v594_v10 = vpop.f32.mrf.mxu2 }
 0x2b7   :  { %v744_v11 = vadd.f32 %v743_v63, %v594_v10 }
 0x2b9   :  { %v789_v12 = vadd.f32 %v1393_v52, %v744_v11 }
 0x2bb   :  { %805 = vst [vmem:[#allocation7 + $0x18] sm:$0xff] %v789_v12 }
 0x2be   :  { %v597_v14 = vpop.f32.mrf.mxu2 }
 0x2bf   :  { %v747_v15 = vadd.f32 %v746_v3, %v597_v14 }
 0x2c1   :  { %v790_v16 = vadd.f32 %v1393_v52, %v747_v15 }
 0x2c3   :  { %806 = vst [vmem:[#allocation7 + $0x20] sm:$0xff] %v790_v16 }
 0x2c6   :  { %v600_v18 = vpop.f32.mrf.mxu2 }
 0x2c7   :  { %v750_v19 = vadd.f32 %v749_v8, %v600_v18 }
 0x2c9   :  { %v791_v20 = vadd.f32 %v1393_v52, %v750_v19 }
 0x2cb   :  { %807 = vst [vmem:[#allocation7 + $0x28] sm:$0xff] %v791_v20 }
 0x2ce   :  { %v603_v21 = vpop.f32.mrf.mxu2 }
 0x2cf   :  { %v753_v23 = vadd.f32 %v752_v13, %v603_v21 }
 0x2d1   :  { %v792_v24 = vadd.f32 %v1393_v52, %v753_v23 }
 0x2d3   :  { %808 = vst [vmem:[#allocation7 + $0x30] sm:$0xff] %v792_v24 }
 0x2d6   :  { %v606_v27 = vpop.f32.mrf.mxu2 }
 0x2d7   :  { %v756_v28 = vadd.f32 %v755_v17, %v606_v27 }
 0x2d9   :  { %v793_v32 = vadd.f32 %v1393_v52, %v756_v28 }
 0x2db   :  { %809 = vst [vmem:[#allocation7 + $0x38] sm:$0xff] %v793_v32 }
 0x2de   :  { %v609_v33 = vpop.f32.mrf.mxu2 }
 0x2df   :  { %v759_v34 = vadd.f32 %v758_v22, %v609_v33 }
 0x2e1   :  { %v794_v39 = vadd.f32 %v1393_v52, %v759_v34 }
 0x2e3   :  { %810 = vst [vmem:[#allocation7 + $0x40] sm:$0xff] %v794_v39 }
 0x2e6   :  { %v612_v50 = vpop.f32.mrf.mxu2 }
 0x2e7   :  { %v762_v51 = vadd.f32 %v761_v29, %v612_v50 }
 0x2e9   :  { %v795_v53 = vadd.f32 %v1393_v52, %v762_v51 }
 0x2eb   :  { %811 = vst [vmem:[#allocation7 + $0x48] sm:$0xff] %v795_v53 }
 0x2ee   :  { %v615_v56 = vpop.f32.mrf.mxu2 }
 0x2ef   :  { %v765_v57 = vadd.f32 %v764_v40, %v615_v56 }
 0x2f1   :  { %v796_v58 = vadd.f32 %v1393_v52, %v765_v57 }
 0x2f3   :  { %812 = vst [vmem:[#allocation7 + $0x50] sm:$0xff] %v796_v58 }
 0x2f6   :  { %v618_v48 = vpop.f32.mrf.mxu2 }
 0x2f7   :  { %v768_v46 = vadd.f32 %v767_v54, %v618_v48 }
 0x2f9   :  { %v797_v45 = vadd.f32 %v1393_v52, %v768_v46 }
 0x2fb   :  { %813 = vst [vmem:[#allocation7 + $0x58] sm:$0xff] %v797_v45 }
 0x2fe   :  { %v621_v49 = vpop.f32.mrf.mxu2 }
 0x2ff   :  { %v771_v59 = vadd.f32 %v770_v47, %v621_v49 }
 0x301   :  { %v798_v43 = vadd.f32 %v1393_v52, %v771_v59 }
 0x303   :  { %814 = vst [vmem:[#allocation7 + $0x60] sm:$0xff] %v798_v43 }
 0x306   :  { %v624_v42 = vpop.f32.mrf.mxu2 }
 0x307   :  { %v774_v41 = vadd.f32 %v773_v44, %v624_v42 }
 0x309   :  { %v799_v38 = vadd.f32 %v1393_v52, %v774_v41 }
 0x30b   :  { %815 = vst [vmem:[#allocation7 + $0x68] sm:$0xff] %v799_v38 }
 0x30e   :  { %v627_v36 = vpop.f32.mrf.mxu2 }
 0x30f   :  { %v777_v35 = vadd.f32 %v776_v37, %v627_v36 }
 0x311   :  { %v800_v31 = vadd.f32 %v1393_v52, %v777_v35 }
 0x313   :  { %816 = vst [vmem:[#allocation7 + $0x70] sm:$0xff] %v800_v31 }
 0x316   :  { %v630_v60 = vpop.f32.mrf.mxu2 }
 0x317   :  { %v780_v26 = vadd.f32 %v779_v30, %v630_v60 }
 0x319   :  { %v801_v61 = vadd.f32 %v1393_v52, %v780_v26 }
 0x31b   :  { %817 = vst [vmem:[#allocation7 + $0x78] sm:$0xff] %v801_v61 }
 0x31c   :  { %830 = dma.vmem_to_hbm [thread:$0]  %s823_s21, 2048, %s825_s24, [#allocation6], %s966_s29, %s966_s29, %s967_s30  }
 0x31d   :  { %963 = dma.done.wait [#allocation6], 2048  }
 0x31e   :  { %964 = vsyncadd [#allocation6], 4294965248 }
 0x31f   :  { %835 = vsyncpa [#allocation5], 1 }
 0x320   :  { %836 = vsyncpa [#allocation6], 1 }

</bundles_post_ra>
